<compile_context>
chip_gen: v7x
topology: tpu7x:2x2x1
jax: 0.10.0
libtpu: 0.0.40
codegen_flags: <defaults>
</compile_context>

<pallas_src>
import functools

import jax
import jax.numpy as jnp
from jax.experimental import pallas as pl
from jax.experimental.pallas import tpu as pltpu


def _round_up(x, m):
    return ((x + m - 1) // m) * m


def _pick_tile_m(B):
    """Largest sublane-aligned batch tile with bounded padding waste.

    Capped at ceil(B/2) (rounded to 8) for B >= 16 so the grid has at least
    two steps and the "parallel" batch axis shards across v7x's 2 TensorCores.
    """
    b8 = _round_up(B, 8)
    cap = min(1024, _round_up(-(-B // 2), 8)) if B >= 16 else b8
    best = 8
    for tm in (1024, 512, 256, 128, 64, 32, 16, 8):
        if tm > cap:
            continue
        padded = _round_up(B, tm)
        waste = (padded - B) / padded
        if waste <= 0.125:
            best = tm
            break
    return best


def linear_kernel(x_ref, w_ref, b_ref, o_ref):
    # x_ref: (TM, K)      one batch tile (auto double-buffered)
    # w_ref: (K, N_pad)   pre-transposed weight, resident across the grid
    # b_ref: (1, N_pad)   bias row, resident
    # o_ref: (TM, N_pad)  lane-dense output (N padded to a multiple of 128)
    acc = jnp.dot(x_ref[...], w_ref[...], preferred_element_type=jnp.float32)
    o_ref[...] = (acc + b_ref[...]).astype(o_ref.dtype)


def prepare_linear_params(weight, bias):
    """One-time parameter prep (outside the per-call hot path).

    Transposes the nn.Linear weight (num_outputs, num_inputs) ->
    (num_inputs, n_pad) and pads num_outputs up to a multiple of 128 so the
    kernel contraction is the canonical (M,K)x(K,N) MXU feed with lane-dense,
    unmasked output stores.
    """
    num_outputs, num_inputs = weight.shape
    n_pad = _round_up(num_outputs, 128)
    w_t = jnp.zeros((num_inputs, n_pad), weight.dtype).at[:, :num_outputs].set(weight.T)
    b_p = jnp.zeros((1, n_pad), bias.dtype).at[0, :num_outputs].set(bias)
    return w_t, b_p


@functools.partial(jax.jit, static_argnames=("num_outputs",))
def linear_net_forward(x, w_t, b_pad, num_outputs):
    """LinearNet.forward: y = Linear(x.view(B, -1))."""
    B = x.shape[0]
    num_inputs, n_pad = w_t.shape

    # Matches torch's x.view(x.shape[0], -1) on row-major NCHW.
    x_flat = x.reshape(B, -1)

    # Waste-aware, sublane-aligned batch tiling (>= 2 grid steps for large B).
    tm = _pick_tile_m(B)
    b_padded = _round_up(B, tm)
    if b_padded != B:
        x_flat = jnp.pad(x_flat, ((0, b_padded - B), (0, 0)))

    grid = (b_padded // tm,)
    itemsize = x_flat.dtype.itemsize
    bytes_accessed = (x_flat.size + w_t.size + b_pad.size + b_padded * n_pad) * itemsize

    # VMEM budget: double-buffered x tile + (default-buffered) weight + bias +
    # double-buffered output tile, with headroom.  Kept under v7x's 64 MiB.
    vmem_needed = (2 * tm * num_inputs + 2 * num_inputs * n_pad
                   + 2 * n_pad + 2 * tm * n_pad) * itemsize
    vmem_limit = int(min(48 * 1024 * 1024, max(2 * vmem_needed, 16 * 1024 * 1024)))

    out = pl.pallas_call(
        linear_kernel,
        out_shape=jax.ShapeDtypeStruct((b_padded, n_pad), jnp.float32),
        grid=grid,
        in_specs=[
            pl.BlockSpec((tm, num_inputs), lambda i: (i, 0)),      # x batch tile
            pl.BlockSpec((num_inputs, n_pad), lambda i: (0, 0)),   # full weight, resident
            pl.BlockSpec((1, n_pad), lambda i: (0, 0)),            # bias row, resident
        ],
        out_specs=pl.BlockSpec((tm, n_pad), lambda i: (i, 0)),
        compiler_params=pltpu.CompilerParams(
            dimension_semantics=("parallel",),   # batch grid shards across v7x's 2 TCs
            vmem_limit_bytes=vmem_limit,
        ),
        cost_estimate=pl.CostEstimate(
            flops=2 * b_padded * num_inputs * n_pad,
            transcendentals=0,
            bytes_accessed=bytes_accessed,
        ),
    )(x_flat, w_t, b_pad)

    return out[:B, :num_outputs]


if __name__ == "__main__":
    # Small shapes consistent with the module: batch=16, C=4, H=W=16
    # -> num_inputs = 4*16*16 = 1024, num_outputs = 10 (softmax-regression head).
    # B=16 exercises a 2-step "parallel" grid (tm=8) while staying small.
    B, C, H, W = 16, 4, 16, 16
    num_inputs = C * H * W
    num_outputs = 10

    key = jax.random.PRNGKey(0)
    kx, kw, kb = jax.random.split(key, 3)

    x = jax.random.normal(kx, (B, C, H, W), dtype=jnp.float32)

    # Deterministic init mimicking nn.Linear default: U(-1/sqrt(in), 1/sqrt(in))
    bound = 1.0 / (num_inputs ** 0.5)
    weight = jax.random.uniform(kw, (num_outputs, num_inputs), jnp.float32, -bound, bound)
    bias = jax.random.uniform(kb, (num_outputs,), jnp.float32, -bound, bound)

    # One-time param prep (pre-transpose + lane-dense pad), hoisted out of the
    # per-call hot path.  For tiny per-call batches this weight (512 KB padded)
    # dominates traffic; in a real serving path keep it resident across calls.
    w_t, b_pad = prepare_linear_params(weight, bias)

    y = linear_net_forward(x, w_t, b_pad, num_outputs)
    jax.block_until_ready(y)

    # Reference check in plain JAX.
    y_ref = x.reshape(B, -1) @ weight.T + bias
    assert y.shape == (B, num_outputs)
    assert jnp.allclose(y, y_ref, atol=1e-4, rtol=1e-4)

    print("KERNEL_OK")
</pallas_src>

<mosaic_0001>
module attributes {stable_mosaic.version = 11 : i64} {
  func.func @linear_kernel(%arg0: i32, %arg1: memref<8x1024xf32, #tpu.memory_space<vmem>>, %arg2: memref<1024x128xf32, #tpu.memory_space<vmem>>, %arg3: memref<1x128xf32, #tpu.memory_space<vmem>>, %arg4: memref<8x128xf32, #tpu.memory_space<vmem>>) attributes {dimension_semantics = [#tpu.dimension_semantics<parallel>], iteration_bounds = array<i64: 2>, scalar_prefetch = 0 : i64, scratch_operands = 0 : i64, tpu.core_type = #tpu.core_type<tc>, window_params = [{transform_indices = @transform_0, window_bounds = array<i64: 8, 1024>}, {pipeline_mode = #tpu.pipeline_mode<synchronous>, transform_indices = @transform_1, window_bounds = array<i64: 1024, 128>}, {pipeline_mode = #tpu.pipeline_mode<synchronous>, transform_indices = @transform_2, window_bounds = array<i64: 1, 128>}, {transform_indices = @transform_3, window_bounds = array<i64: 8, 128>}]} {
    %c0 = arith.constant 0 : index
    %c0_0 = arith.constant 0 : index
    %0 = vector.load %arg1[%c0, %c0_0] : memref<8x1024xf32, #tpu.memory_space<vmem>>, vector<8x1024xf32>
    %c0_1 = arith.constant 0 : index
    %c0_2 = arith.constant 0 : index
    %1 = vector.load %arg2[%c0_1, %c0_2] : memref<1024x128xf32, #tpu.memory_space<vmem>>, vector<1024x128xf32>
    %cst = arith.constant dense<0.000000e+00> : vector<8x128xf32>
    %2 = tpu.matmul %0, %1, %cst {dimension_numbers = #tpu.dot_dimension_numbers<[1], [0], [0], [1], [0, 0, 1, 1], [], []>} : vector<8x1024xf32>, vector<1024x128xf32>, vector<8x128xf32> -> vector<8x128xf32>
    %c0_3 = arith.constant 0 : index
    %c0_4 = arith.constant 0 : index
    %3 = vector.load %arg3[%c0_3, %c0_4] : memref<1x128xf32, #tpu.memory_space<vmem>>, vector<1x128xf32>
    %4 = vector.broadcast %3 : vector<1x128xf32> to vector<8x128xf32>
    %5 = arith.addf %2, %4 : vector<8x128xf32>
    %c0_5 = arith.constant 0 : index
    %c0_6 = arith.constant 0 : index
    %6 = vector.load %arg4[%c0_5, %c0_6] : memref<8x128xf32, #tpu.memory_space<vmem>>, vector<8x128xf32>
    tpu.vector_store %arg4[%c0_5, %c0_6], %5 {strides = array<i32>} : memref<8x128xf32, #tpu.memory_space<vmem>>, vector<8x128xf32>,
    return
  }
  func.func @transform_0(%arg0: i32) -> (i32, i32) {
    %c0_i32 = arith.constant 0 : i32
    %c0_i32_0 = arith.constant 0 : i32
    return %arg0, %c0_i32 : i32, i32
  }
  func.func @transform_1(%arg0: i32) -> (i32, i32) {
    %c0_i32 = arith.constant 0 : i32
    %c0_i32_0 = arith.constant 0 : i32
    %c0_i32_1 = arith.constant 0 : i32
    return %c0_i32, %c0_i32_0 : i32, i32
  }
  func.func @transform_2(%arg0: i32) -> (i32, i32) {
    %c0_i32 = arith.constant 0 : i32
    %c0_i32_0 = arith.constant 0 : i32
    %c0_i32_1 = arith.constant 0 : i32
    return %c0_i32, %c0_i32_0 : i32, i32
  }
  func.func @transform_3(%arg0: i32) -> (i32, i32) {
    %c0_i32 = arith.constant 0 : i32
    %c0_i32_0 = arith.constant 0 : i32
    return %arg0, %c0_i32 : i32, i32
  }
}

</mosaic_0001>

<bundles_post_ra>
// kernel: linear_net_forward.1
= control target key start
LH: loop header
LB: loop body
LE: loop exit
PB: predicated region body
PF: predicated region fallthrough
CT: control target
= control target key end

     0   :  { %8 = vsyncpa [#allocation3], 0  ;;  %s1573_s0 = inlined_call_operand.vmem [shape: f32[16,1024], index: 0, kind: input, shape index: {}]   ;;  %s1574_s1 = inlined_call_operand.vmem [shape: f32[1024,128], index: 1, kind: input, shape index: {}]   ;;  %s1575_s2 = inlined_call_operand.vmem [shape: f32[1,128], index: 2, kind: input, shape index: {}]   ;;  %s1576_s3 = inlined_call_operand.hbm [shape: f32[16,128], index: 3, kind: output, shape index: {}]  }
   0x1   :  { %10 = vsyncpa [#allocation3 + $0x1], 0  ;;  %s1071_s12 = smov 0   ;;  %s1073_s13 = smov 0  }
   0x2   :  { %s1075_s14 = smov 0   ;;  %s1077_s15 = smov 0  }
   0x3 LB: > { %s1092_s16 = sadd.s32 4294967295, %s1048_s15   ;;  %s666_s17 = sadd.s32 4294967294, %s1048_s15   ;;  %s1048_s15 = sphi %s1077_s15, %s1582_s15   ;;  %s1044_s14 = sphi %s1075_s14, %s1581_s14   ;;  %s1040_s13 = sphi %s1073_s13, %s1580_s13   ;;  %s1036_s12 = sphi %s1071_s12, %s1579_s12  }
   0x4   : > { %s1096_s18 = sadd.s32 1, %s1048_s15   ;;  %s91_s19 = sadd.s32 1, %s1044_s14 }
   0x5   : > { %s88_s20 = ssub.s32 %s1048_s15, %s1096_s18  ;;  %p101_p0 = scmp.ne.s32.totalorder %s1044_s14, %s1040_s13 }
   0x6   : > { %p89_p1 = scmp.eq.s32.totalorder %s88_s20, 0  ;;  %p102_p2 = scmp.eq.s32.totalorder %s1092_s16, 1 }
   0x7   : > { %p107_p3 = scmp.ne.s32.totalorder %s1040_s13, %s1036_s12  ;;  %p108_p4 = scmp.eq.s32.totalorder %s666_s17, 1 }
   0x8   : > { %s1107_s21 = scalar_select %p89_p1, %s1044_s14, %s91_s19  }
   0x9   : > { %p1109_p5 = por %p102_p2, %p101_p0  ;;  %p1113_p6 = por %p108_p4, %p107_p3 }
   0xa   : > { %p669_p7 = scmp.ge.s32.totalorder %s1048_s15, 1  ;;  %p140_p8 = scmp.lt.s32.totalorder %s1048_s15, 3 }
   0xc   : > { %p141_p9 = pnand %p669_p7, %p140_p8 }
   0xd   : > { %v193_v0 = vld [vmem:[%s1574_s1 + $0x80] sm:$0xff] (!%p141_p9)  ;;  %v194_v1 = vld [vmem:[%s1574_s1 + $0x88] sm:$0xff] (!%p141_p9)  ;;  %v195_v11 = vld [vmem:[%s1574_s1 + $0x90] sm:$0xff] (!%p141_p9)  ;;  %p164_p10 = scmp.lt.s32.totalorder (!%p141_p9), %s1092_s16, 1  ;;  %s161_s28 = sand.u32 (!%p141_p9), 1, %s1040_s13  }
   0xe   : > { %144 = sbr.rel (%p141_p9) target bundleno = 313 (0x139), region = 32  ;;  %v177_v2 = vld [vmem:[%s1574_s1] sm:$0xff] (!%p141_p9)  ;;  %v819_v3 = vpack.c.bf16 (!%p141_p9), %v194_v1, %v193_v0  ;;  %v178_v4 = vld [vmem:[%s1574_s1 + $0x8] sm:$0xff] (!%p141_p9)  ;;  %v196_v13 = vld [vmem:[%s1574_s1 + $0x98] sm:$0xff] (!%p141_p9)  ;;  %s670_s29 = sshll.u32 (!%p141_p9), %s161_s28, 3 }
   0xf   : > { %v225_v5 = vld [vmem:[%s1574_s1 + $0x180] sm:$0xff] (!%p141_p9)  ;;  %v226_v6 = vld [vmem:[%s1574_s1 + $0x188] sm:$0xff] (!%p141_p9)  ;;  %v821_v7 = vpack.c.bf16 (!%p141_p9), %v178_v4, %v177_v2  ;;  %v179_v14 = vld [vmem:[%s1574_s1 + $0x10] sm:$0xff] (!%p141_p9)  ;;  %v823_v16 = vpack.c.bf16 (!%p141_p9), %v196_v13, %v195_v11  ;;  %s163_s30 = scalar_lea.vmem (!%p141_p9), [#allocation2], %s670_s29  ;;  %s594_s6 = scalar_lea.sflag (!%p141_p9), [#allocation3], %s161_s28 }
  0x10   : > { %v851_v8 = vpack.c.bf16 (!%p141_p9), %v226_v6, %v225_v5  ;;  %v209_v9 = vld [vmem:[%s1574_s1 + $0x100] sm:$0xff] (!%p141_p9)  ;;  %v210_v10 = vld [vmem:[%s1574_s1 + $0x108] sm:$0xff] (!%p141_p9)  ;;  %820 = vmatprep.subr.bf16.mxu0 (!%p141_p9), %v819_v3  ;;  %v180_v15 = vld [vmem:[%s1574_s1 + $0x18] sm:$0xff] (!%p141_p9) }
  0x11   : > { %v853_v12 = vpack.c.bf16 (!%p141_p9), %v210_v10, %v209_v9  ;;  %822 = vmatpush3.bf16.msra.mxu0 (!%p141_p9), %v821_v7  ;;  %v825_v17 = vpack.c.bf16 (!%p141_p9), %v180_v15, %v179_v14  ;;  %v227_v18 = vld [vmem:[%s1574_s1 + $0x190] sm:$0xff] (!%p141_p9)  ;;  %v228_v19 = vld [vmem:[%s1574_s1 + $0x198] sm:$0xff] (!%p141_p9)  ;;  %v197_v23 = vld [vmem:[%s1574_s1 + $0xa0] sm:$0xff] (!%p141_p9) }
  0x12   : > { %852 = vmatprep.subr.bf16.mxu1 (!%p141_p9), %v851_v8  ;;  %v211_v20 = vld [vmem:[%s1574_s1 + $0x110] sm:$0xff] (!%p141_p9)  ;;  %v855_v21 = vpack.c.bf16 (!%p141_p9), %v228_v19, %v227_v18  ;;  %v212_v22 = vld [vmem:[%s1574_s1 + $0x118] sm:$0xff] (!%p141_p9)  ;;  %v198_v24 = vld [vmem:[%s1574_s1 + $0xa8] sm:$0xff] (!%p141_p9)  ;;  %824 = vmatprep.subr.bf16.mxu0 (!%p141_p9), %v823_v16 }
  0x13   : > { %854 = vmatpush3.bf16.msra.mxu1 (!%p141_p9), %v853_v12  ;;  %v857_v25 = vpack.c.bf16 (!%p141_p9), %v212_v22, %v211_v20  ;;  %v827_v26 = vpack.c.bf16 (!%p141_p9), %v198_v24, %v197_v23  ;;  %v181_v27 = vld [vmem:[%s1574_s1 + $0x20] sm:$0xff] (!%p141_p9)  ;;  %v182_v28 = vld [vmem:[%s1574_s1 + $0x28] sm:$0xff] (!%p141_p9)  ;;  %v199_v35 = vld [vmem:[%s1574_s1 + $0xb0] sm:$0xff] (!%p141_p9) }
  0x14   : > { %v229_v29 = vld [vmem:[%s1574_s1 + $0x1a0] sm:$0xff] (!%p141_p9)  ;;  %856 = vmatprep.subr.bf16.mxu1 (!%p141_p9), %v855_v21  ;;  %v230_v30 = vld [vmem:[%s1574_s1 + $0x1a8] sm:$0xff] (!%p141_p9)  ;;  %v829_v33 = vpack.c.bf16 (!%p141_p9), %v182_v28, %v181_v27  ;;  %v200_v36 = vld [vmem:[%s1574_s1 + $0xb8] sm:$0xff] (!%p141_p9) }
  0x15   : > { %v213_v31 = vld [vmem:[%s1574_s1 + $0x120] sm:$0xff]  ;;  %v214_v32 = vld [vmem:[%s1574_s1 + $0x128] sm:$0xff]  ;;  %826 = vmatpush3.bf16.msra.mxu0 %v825_v17  ;;  %v859_v34 = vpack.c.bf16 %v230_v30, %v229_v29  ;;  %v183_v37 = vld [vmem:[%s1574_s1 + $0x30] sm:$0xff]  ;;  %v831_v39 = vpack.c.bf16 %v200_v36, %v199_v35  ;;  %s1225_s11 = scalar_select %p164_p10, %s1092_s16, 1 }
  0x16   : > { %828 = vmatprep.subr.bf16.mxu0 %v827_v26  ;;  %v861_v38 = vpack.c.bf16 %v214_v32, %v213_v31  ;;  %v184_v40 = vld [vmem:[%s1574_s1 + $0x38] sm:$0xff]  ;;  %v231_v41 = vld [vmem:[%s1574_s1 + $0x1b0] sm:$0xff]  ;;  %v201_v46 = vld [vmem:[%s1574_s1 + $0xc0] sm:$0xff] }
  0x17   : > { %858 = vmatpush3.bf16.msra.mxu1 %v857_v25  ;;  %v232_v42 = vld [vmem:[%s1574_s1 + $0x1b8] sm:$0xff]  ;;  %v215_v44 = vld [vmem:[%s1574_s1 + $0x130] sm:$0xff]  ;;  %v202_v47 = vld [vmem:[%s1574_s1 + $0xc8] sm:$0xff]  ;;  %v833_v48 = vpack.c.bf16 %v184_v40, %v183_v37  ;;  %s678_s24 = sshll.u32 %s1225_s11, 6 }
  0x18   : > { %860 = vmatprep.subr.bf16.mxu1 %v859_v34  ;;  %v863_v43 = vpack.c.bf16 %v232_v42, %v231_v41  ;;  %v216_v45 = vld [vmem:[%s1574_s1 + $0x138] sm:$0xff]  ;;  %v233_v49 = vld [vmem:[%s1574_s1 + $0x1c0] sm:$0xff]  ;;  %v234_v50 = vld [vmem:[%s1574_s1 + $0x1c8] sm:$0xff]  ;;  %v835_v52 = vpack.c.bf16 %v202_v47, %v201_v46  ;;  %s1279_s17 = scalar_lea.vmem %s1573_s0, %s678_s24  ;;  %s607_s24 = sshll.u32 %s163_s30, 4  ;;  %s1533_s24 = int_to_ptr.vmem [resolvable:$true] %s607_s24 }
  0x19   : > { %830 = vmatpush3.bf16.msra.mxu0 %v829_v33  ;;  %v865_v51 = vpack.c.bf16 %v216_v45, %v215_v44  ;;  %v185_v53 = vld [vmem:[%s1574_s1 + $0x40] sm:$0xff]  ;;  %v186_v54 = vld [vmem:[%s1574_s1 + $0x48] sm:$0xff]  ;;  %v867_v56 = vpack.c.bf16 %v234_v50, %v233_v49  ;;  %v203_v58 = vld [vmem:[%s1574_s1 + $0xd0] sm:$0xff]  ;;  %s986_s7 = scalar_lea.vmem %s1533_s24, 128 }
  0x1a   : > { %832 = vmatprep.subr.bf16.mxu0 %v831_v39  ;;  %v217_v55 = vld [vmem:[%s1574_s1 + $0x140] sm:$0xff]  ;;  %v218_v57 = vld [vmem:[%s1574_s1 + $0x148] sm:$0xff]  ;;  %v204_v59 = vld [vmem:[%s1574_s1 + $0xd8] sm:$0xff]  ;;  %v837_v62 = vpack.c.bf16 %v186_v54, %v185_v53  ;;  %p987_p11 = scmp.ne.s32.totalorder %s1533_s24, %s986_s7 }
  0x1b   : > { %862 = vmatpush3.bf16.msra.mxu1 %v861_v38  ;;  %v235_v60 = vld [vmem:[%s1574_s1 + $0x1d0] sm:$0xff]  ;;  %v236_v61 = vld [vmem:[%s1574_s1 + $0x1d8] sm:$0xff]  ;;  %v869_v63 = vpack.c.bf16 %v218_v57, %v217_v55  ;;  %v839_v0 = vpack.c.bf16 %v204_v59, %v203_v58  ;;  %v205_v6 = vld [vmem:[%s1574_s1 + $0xe0] sm:$0xff] }
  0x1c   : > { %864 = vmatprep.subr.bf16.mxu1 %v863_v43  ;;  %v187_v1 = vld [vmem:[%s1574_s1 + $0x50] sm:$0xff]  ;;  %v188_v2 = vld [vmem:[%s1574_s1 + $0x58] sm:$0xff]  ;;  %v871_v4 = vpack.c.bf16 %v236_v61, %v235_v60  ;;  %v206_v7 = vld [vmem:[%s1574_s1 + $0xe8] sm:$0xff]  ;;  %p988_p12 = pnand %p987_p11, %p1109_p5 }
  0x1d   : > { %834 = vmatpush3.bf16.msra.mxu0 %v833_v48  ;;  %v219_v3 = vld [vmem:[%s1574_s1 + $0x150] sm:$0xff]  ;;  %v220_v5 = vld [vmem:[%s1574_s1 + $0x158] sm:$0xff]  ;;  %v237_v8 = vld [vmem:[%s1574_s1 + $0x1e0] sm:$0xff]  ;;  %v841_v10 = vpack.c.bf16 %v188_v2, %v187_v1  ;;  %v843_v14 = vpack.c.bf16 %v206_v7, %v205_v6 }
  0x1e   : > { %836 = vmatprep.subr.bf16.mxu0 %v835_v52  ;;  %v238_v9 = vld [vmem:[%s1574_s1 + $0x1e8] sm:$0xff]  ;;  %v189_v11 = vld [vmem:[%s1574_s1 + $0x60] sm:$0xff]  ;;  %v873_v13 = vpack.c.bf16 %v220_v5, %v219_v3  ;;  %v207_v19 = vld [vmem:[%s1574_s1 + $0xf0] sm:$0xff]  ;;  %p989_p13 = pneg %p988_p12 }
  0x1f   : > { %866 = vmatpush3.bf16.msra.mxu1 %v865_v51  ;;  %v190_v12 = vld [vmem:[%s1574_s1 + $0x68] sm:$0xff]  ;;  %v221_v15 = vld [vmem:[%s1574_s1 + $0x160] sm:$0xff]  ;;  %v875_v18 = vpack.c.bf16 %v238_v9, %v237_v8  ;;  %v208_v20 = vld [vmem:[%s1574_s1 + $0xf8] sm:$0xff] }
  0x20   : > { %868 = vmatprep.subr.bf16.mxu1 %v867_v56  ;;  %v222_v16 = vld [vmem:[%s1574_s1 + $0x168] sm:$0xff]  ;;  %v172_v21 = vld [vmem:[%s1279_s17 + $0x18] sm:$0xff]  ;;  %v239_v22 = vld [vmem:[%s1574_s1 + $0x1f0] sm:$0xff]  ;;  %v845_v24 = vpack.c.bf16 %v190_v12, %v189_v11  ;;  %v847_v26 = vpack.c.bf16 %v208_v20, %v207_v19 }
  0x21   : > { %838 = vmatpush3.bf16.msra.mxu0 %v837_v62  ;;  %v170_v17 = vld [vmem:[%s1279_s17 + $0x8] sm:$0xff]  ;;  %v240_v23 = vld [vmem:[%s1574_s1 + $0x1f8] sm:$0xff]  ;;  %446 = vmatprep.mubr.f32.mxu1 %v172_v21  ;;  %v877_v25 = vpack.c.bf16 %v222_v16, %v221_v15  ;;  %v191_v27 = vld [vmem:[%s1574_s1 + $0x70] sm:$0xff] }
  0x22   : > { %840 = vmatprep.subr.bf16.mxu0 %v839_v0  ;;  %376 = vmatprep.mubr.f32.mxu0 %v170_v17  ;;  %v192_v28 = vld [vmem:[%s1574_s1 + $0x78] sm:$0xff]  ;;  %v223_v29 = vld [vmem:[%s1574_s1 + $0x170] sm:$0xff]  ;;  %v879_v30 = vpack.c.bf16 %v240_v23, %v239_v22  ;;  %v257_v32 = vld [vmem:[%s1574_s1 + $0x280] sm:$0xff] }
  0x23   : > { %870 = vmatpush3.bf16.msra.mxu1 %v869_v63  ;;  %v224_v31 = vld [vmem:[%s1574_s1 + $0x178] sm:$0xff]  ;;  %v258_v33 = vld [vmem:[%s1574_s1 + $0x288] sm:$0xff]  ;;  %v289_v34 = vld [vmem:[%s1574_s1 + $0x380] sm:$0xff]  ;;  %v849_v36 = vpack.c.bf16 %v192_v28, %v191_v27 }
  0x24   : > { %872 = vmatprep.subr.bf16.mxu1 %v871_v4  ;;  %v290_v35 = vld [vmem:[%s1574_s1 + $0x388] sm:$0xff]  ;;  %v881_v37 = vpack.c.bf16 %v224_v31, %v223_v29  ;;  %v883_v38 = vpack.c.bf16 %v258_v33, %v257_v32  ;;  %v241_v39 = vld [vmem:[%s1574_s1 + $0x200] sm:$0xff]  ;;  %v259_v44 = vld [vmem:[%s1574_s1 + $0x290] sm:$0xff] }
  0x25   : > { %842 = vmatpush3.bf16.msra.mxu0 %v841_v10  ;;  %v242_v40 = vld [vmem:[%s1574_s1 + $0x208] sm:$0xff]  ;;  %v273_v41 = vld [vmem:[%s1574_s1 + $0x300] sm:$0xff]  ;;  %v915_v42 = vpack.c.bf16 %v290_v35, %v289_v34  ;;  %v260_v45 = vld [vmem:[%s1574_s1 + $0x298] sm:$0xff] }
  0x26   : > { %844 = vmatprep.subr.bf16.mxu0 %v843_v14  ;;  %v274_v43 = vld [vmem:[%s1574_s1 + $0x308] sm:$0xff]  ;;  %v291_v46 = vld [vmem:[%s1574_s1 + $0x390] sm:$0xff]  ;;  %v292_v47 = vld [vmem:[%s1574_s1 + $0x398] sm:$0xff]  ;;  %v885_v49 = vpack.c.bf16 %v242_v40, %v241_v39  ;;  %v887_v52 = vpack.c.bf16 %v260_v45, %v259_v44 }
  0x27   : > { %874 = vmatpush3.bf16.msra.mxu1 %v873_v13  ;;  %v169_v48 = vld [vmem:[%s1279_s17] sm:$0xff]  ;;  %v171_v50 = vld [vmem:[%s1279_s17 + $0x10] sm:$0xff]  ;;  %v917_v51 = vpack.c.bf16 %v274_v43, %v273_v41  ;;  %v244_v54 = vld [vmem:[%s1574_s1 + $0x218] sm:$0xff]  ;;  %v919_v56 = vpack.c.bf16 %v292_v47, %v291_v46 }
  0x28   : > { %876 = vmatprep.subr.bf16.mxu1 %v875_v18  ;;  %v243_v53 = vld [vmem:[%s1574_s1 + $0x210] sm:$0xff]  ;;  %v276_v57 = vld [vmem:[%s1574_s1 + $0x318] sm:$0xff]  ;;  %v261_v58 = vld [vmem:[%s1574_s1 + $0x2a0] sm:$0xff] }
  0x29   : > { %846 = vmatpush3.bf16.msra.mxu0 %v845_v24  ;;  %v275_v55 = vld [vmem:[%s1574_s1 + $0x310] sm:$0xff]  ;;  %v262_v59 = vld [vmem:[%s1574_s1 + $0x2a8] sm:$0xff]  ;;  %v293_v60 = vld [vmem:[%s1574_s1 + $0x3a0] sm:$0xff]  ;;  %v889_v62 = vpack.c.bf16 %v244_v54, %v243_v53 }
  0x2a   : > { %848 = vmatprep.subr.bf16.mxu0 %v847_v26  ;;  %v294_v61 = vld [vmem:[%s1574_s1 + $0x3a8] sm:$0xff]  ;;  %v921_v63 = vpack.c.bf16 %v276_v57, %v275_v55  ;;  %v891_v0 = vpack.c.bf16 %v262_v59, %v261_v58  ;;  %v245_v1 = vld [vmem:[%s1574_s1 + $0x220] sm:$0xff]  ;;  %v263_v6 = vld [vmem:[%s1574_s1 + $0x2b0] sm:$0xff] }
  0x2b   : > { %878 = vmatpush3.bf16.msra.mxu1 %v877_v25  ;;  %v246_v2 = vld [vmem:[%s1574_s1 + $0x228] sm:$0xff]  ;;  %v277_v3 = vld [vmem:[%s1574_s1 + $0x320] sm:$0xff]  ;;  %v923_v4 = vpack.c.bf16 %v294_v61, %v293_v60  ;;  %v264_v7 = vld [vmem:[%s1574_s1 + $0x2b8] sm:$0xff] }
  0x2c   : > { %880 = vmatprep.subr.bf16.mxu1 %v879_v30  ;;  %v278_v5 = vld [vmem:[%s1574_s1 + $0x328] sm:$0xff]  ;;  %v295_v8 = vld [vmem:[%s1574_s1 + $0x3b0] sm:$0xff]  ;;  %v296_v9 = vld [vmem:[%s1574_s1 + $0x3b8] sm:$0xff]  ;;  %v893_v10 = vpack.c.bf16 %v246_v2, %v245_v1  ;;  %v895_v12 = vpack.c.bf16 %v264_v7, %v263_v6 }
  0x2d   : > { %850 = vmatpush3.bf16.msra.mxu0 %v849_v36  ;;  %v925_v11 = vpack.c.bf16 %v278_v5, %v277_v3  ;;  %v247_v13 = vld [vmem:[%s1574_s1 + $0x230] sm:$0xff]  ;;  %v248_v14 = vld [vmem:[%s1574_s1 + $0x238] sm:$0xff]  ;;  %v927_v16 = vpack.c.bf16 %v296_v9, %v295_v8  ;;  %v265_v18 = vld [vmem:[%s1574_s1 + $0x2c0] sm:$0xff] }
  0x2e   : > { %884 = vmatprep.subr.bf16.mxu0 %v883_v38  ;;  %v279_v15 = vld [vmem:[%s1574_s1 + $0x330] sm:$0xff]  ;;  %v280_v17 = vld [vmem:[%s1574_s1 + $0x338] sm:$0xff]  ;;  %v266_v19 = vld [vmem:[%s1574_s1 + $0x2c8] sm:$0xff]  ;;  %v897_v22 = vpack.c.bf16 %v248_v14, %v247_v13 }
  0x2f   : > { %882 = vmatpush3.bf16.msra.mxu1 %v881_v37  ;;  %v297_v20 = vld [vmem:[%s1574_s1 + $0x3c0] sm:$0xff]  ;;  %v298_v21 = vld [vmem:[%s1574_s1 + $0x3c8] sm:$0xff]  ;;  %v176_v24 = vld [vmem:[%s1279_s17 + $0x38] sm:$0xff]  ;;  %v929_v25 = vpack.c.bf16 %v280_v17, %v279_v15  ;;  %v899_v26 = vpack.c.bf16 %v266_v19, %v265_v18 }
  0x30   : > { %916 = vmatprep.subr.bf16.mxu1 %v915_v42  ;;  %377 = vmatmul.mubr.f32.vlgmr.msra.gmra.mrb[0].mxu0 %v169_v48  ;;  %v174_v23 = vld [vmem:[%s1279_s17 + $0x28] sm:$0xff]  ;;  %v249_v27 = vld [vmem:[%s1574_s1 + $0x240] sm:$0xff]  ;;  %v931_v30 = vpack.c.bf16 %v298_v21, %v297_v20  ;;  %v267_v32 = vld [vmem:[%s1574_s1 + $0x2d0] sm:$0xff] }
  0x31   : > { %886 = vmatpush3.bf16.msra.mxu0 %v885_v49  ;;  %v250_v28 = vld [vmem:[%s1574_s1 + $0x248] sm:$0xff]  ;;  %v281_v29 = vld [vmem:[%s1574_s1 + $0x340] sm:$0xff]  ;;  %v268_v33 = vld [vmem:[%s1574_s1 + $0x2d8] sm:$0xff]  ;;  %516 = vmatprep.mubr.f32.mxu0 %v174_v23 }
  0x32   : > { %447 = vmatmul.mubr.f32.vlgmr.msra.gmra.mrb[0].mxu1 %v171_v50  ;;  %888 = vmatprep.subr.bf16.mxu0 %v887_v52  ;;  %v282_v31 = vld [vmem:[%s1574_s1 + $0x348] sm:$0xff]  ;;  %v299_v34 = vld [vmem:[%s1574_s1 + $0x3d0] sm:$0xff]  ;;  %v300_v35 = vld [vmem:[%s1574_s1 + $0x3d8] sm:$0xff]  ;;  %v901_v36 = vpack.c.bf16 %v250_v28, %v249_v27  ;;  %v903_v38 = vpack.c.bf16 %v268_v33, %v267_v32 }
  0x33   : > { %918 = vmatpush3.bf16.msra.mxu1 %v917_v51  ;;  %586 = vmatprep.mubr.f32.mxu1 %v176_v24  ;;  %v933_v37 = vpack.c.bf16 %v282_v31, %v281_v29  ;;  %v251_v39 = vld [vmem:[%s1574_s1 + $0x250] sm:$0xff]  ;;  %v252_v40 = vld [vmem:[%s1574_s1 + $0x258] sm:$0xff]  ;;  %v935_v42 = vpack.c.bf16 %v300_v35, %v299_v34  ;;  %v269_v44 = vld [vmem:[%s1574_s1 + $0x2e0] sm:$0xff] }
  0x34   : > { %920 = vmatprep.subr.bf16.mxu1 %v919_v56  ;;  %v283_v41 = vld [vmem:[%s1574_s1 + $0x350] sm:$0xff]  ;;  %v284_v43 = vld [vmem:[%s1574_s1 + $0x358] sm:$0xff]  ;;  %v270_v45 = vld [vmem:[%s1574_s1 + $0x2e8] sm:$0xff]  ;;  %v905_v48 = vpack.c.bf16 %v252_v40, %v251_v39 }
  0x35   : > { %890 = vmatpush3.bf16.msra.mxu0 %v889_v62  ;;  %v301_v46 = vld [vmem:[%s1574_s1 + $0x3e0] sm:$0xff]  ;;  %v302_v47 = vld [vmem:[%s1574_s1 + $0x3e8] sm:$0xff]  ;;  %v937_v49 = vpack.c.bf16 %v284_v43, %v283_v41  ;;  %v907_v50 = vpack.c.bf16 %v270_v45, %v269_v44  ;;  %v271_v56 = vld [vmem:[%s1574_s1 + $0x2f0] sm:$0xff] }
  0x36   : > { %892 = vmatprep.subr.bf16.mxu0 %v891_v0  ;;  %v253_v51 = vld [vmem:[%s1574_s1 + $0x260] sm:$0xff]  ;;  %v254_v52 = vld [vmem:[%s1574_s1 + $0x268] sm:$0xff]  ;;  %v939_v54 = vpack.c.bf16 %v302_v47, %v301_v46  ;;  %v272_v57 = vld [vmem:[%s1574_s1 + $0x2f8] sm:$0xff] }
  0x37   : > { %922 = vmatpush3.bf16.msra.mxu1 %v921_v63  ;;  %v285_v53 = vld [vmem:[%s1574_s1 + $0x360] sm:$0xff]  ;;  %v286_v55 = vld [vmem:[%s1574_s1 + $0x368] sm:$0xff]  ;;  %v303_v58 = vld [vmem:[%s1574_s1 + $0x3f0] sm:$0xff]  ;;  %v909_v60 = vpack.c.bf16 %v254_v52, %v253_v51  ;;  %v911_v62 = vpack.c.bf16 %v272_v57, %v271_v56 }
  0x38   : > { %924 = vmatprep.subr.bf16.mxu1 %v923_v4  ;;  %v304_v59 = vld [vmem:[%s1574_s1 + $0x3f8] sm:$0xff]  ;;  %v941_v61 = vpack.c.bf16 %v286_v55, %v285_v53  ;;  %v255_v63 = vld [vmem:[%s1574_s1 + $0x270] sm:$0xff]  ;;  %v173_v6 = vld [vmem:[%s1279_s17 + $0x20] sm:$0xff] }
  0x39   : > { %894 = vmatpush3.bf16.msra.mxu0 %v893_v10  ;;  %v256_v0 = vld [vmem:[%s1574_s1 + $0x278] sm:$0xff]  ;;  %v943_v1 = vpack.c.bf16 %v304_v59, %v303_v58  ;;  %v287_v2 = vld [vmem:[%s1574_s1 + $0x370] sm:$0xff]  ;;  %v673_v9 = vld [vmem:[%s1575_s2] ss:$0 sm:$0xff] }
  0x3a   : > { %896 = vmatprep.subr.bf16.mxu0 %v895_v12  ;;  %v288_v3 = vld [vmem:[%s1574_s1 + $0x378] sm:$0xff]  ;;  %v913_v4 = vpack.c.bf16 %v256_v0, %v255_v63  ;;  %v175_v7 = vld [vmem:[%s1279_s17 + $0x30] sm:$0xff]  ;;  %s675_s17 = sshll.u32 %s1092_s16, 7  ;;  %s1050_s16 = smov [#allocation2]  }
  0x3b   : > { %926 = vmatpush3.bf16.msra.mxu1 %v925_v11  ;;  %v945_v5 = vpack.c.bf16 %v288_v3, %v287_v2  ;;  %s1531_s5 = scalar_lea.hbm %s1576_s3, %s675_s17  ;;  %s990_s8 = sshll.u32 %s1050_s16, 4  ;;  %s991_s8 = int_to_ptr.vmem [resolvable:$false] %s990_s8 }
  0x3c   : > { %928 = vmatprep.subr.bf16.mxu1 %v927_v16  ;;  %s992_s9 = scalar_lea.vmem %s991_s8, 256  ;;  %p993_p0 = scmp.lt.s32.totalorder %s1533_s24, %s991_s8 }
  0x3d   : > { %898 = vmatpush3.bf16.msra.mxu0 %v897_v22  ;;  %p994_p1 = scmp.lt.s32.totalorder %s992_s9, %s986_s7 }
  0x3e   : > { %900 = vmatprep.subr.bf16.mxu0 %v899_v26 }
  0x3f   : > { %930 = vmatpush3.bf16.msra.mxu1 %v929_v25  ;;  %p995_p2 = por %p994_p1, %p993_p0 }
  0x40   : > { %932 = vmatprep.subr.bf16.mxu1 %v931_v30 }
  0x41   : > { %902 = vmatpush3.bf16.msra.mxu0 %v901_v36  ;;  %p996_p3 = pnand %p995_p2, %p989_p13 }
  0x42   : > { %904 = vmatprep.subr.bf16.mxu0 %v903_v38 }
  0x43   : > { %934 = vmatpush3.bf16.msra.mxu1 %v933_v37 }
  0x44   : > { %936 = vmatprep.subr.bf16.mxu1 %v935_v42 }
  0x45   : > { %906 = vmatpush3.bf16.msra.mxu0 %v905_v48 }
  0x46   : > { %908 = vmatprep.subr.bf16.mxu0 %v907_v50 }
  0x47   : > { %938 = vmatpush3.bf16.msra.mxu1 %v937_v49 }
  0x48   : > { %940 = vmatprep.subr.bf16.mxu1 %v939_v54 }
  0x49   : > { %910 = vmatpush3.bf16.msra.mxu0 %v909_v60 }
  0x4a   : > { %912 = vmatprep.subr.bf16.mxu0 %v911_v62 }
  0x4b   : > { %942 = vmatpush3.bf16.msra.mxu1 %v941_v61 }
  0x4c   : > { %944 = vmatprep.subr.bf16.mxu1 %v943_v1 }
  0x4d   : > { %914 = vmatpush3.bf16.msra.mxu0 %v913_v4 }
  0x4f   : > { %946 = vmatpush3.bf16.msra.mxu1 %v945_v5 }
  0x50   : > { %517 = vmatmul.mubr.f32.vlgmr.msra.gmra.mrb[2].mxu0 %v173_v6 }
  0x52   : > { %587 = vmatmul.mubr.f32.vlgmr.msra.gmra.mrb[2].mxu1 %v175_v7 }
 0x103   : > { %v711_v8 = vpop.f32.mrb[0].mxu0 }
 0x104   : > { %v712_v10 = vpop.f32.mrb[1].mxu0 }
 0x105   : > { %v746_v11 = vpop.f32.mrb[0].mxu1  ;;  %v713_v12 = vadd.f32 %v712_v10, %v711_v8 }
 0x106   : > { %v747_v13 = vpop.f32.mrb[1].mxu1 }
 0x107   : > { %v748_v14 = vadd.f32 %v747_v13, %v746_v11  ;;  %v379_v15 = vadd.f32 %v713_v12, %v673_v9 }
 0x109   : > { %v449_v16 = vadd.f32 %v748_v14, %v379_v15 }
 0x123   : > { %v781_v17 = vpop.f32.mrb[2].mxu0 }
 0x124   : > { %v782_v18 = vpop.f32.mrb[3].mxu0 }
 0x125   : > { %v816_v19 = vpop.f32.mrb[2].mxu1  ;;  %v783_v20 = vadd.f32 %v782_v18, %v781_v17 }
 0x126   : > { %v817_v21 = vpop.f32.mrb[3].mxu1 }
 0x127   : > { %v818_v22 = vadd.f32 %v817_v21, %v816_v19  ;;  %v519_v23 = vadd.f32 %v783_v20, %v449_v16 }
 0x129   : > { %v589_v24 = vadd.f32 %v818_v22, %v519_v23 }
 0x12b   : > { %592 = vst [vmem:[%s163_s30] sm:$0xff] %v589_v24 }
 0x12c   : > { %999 = shalt.err (!%p996_p3)
}
 0x12d   : > { %s1000_s10 = scalar_lea.hbm %s1531_s5, 128  ;;  %s1004_s25 = scalar_lea.hbm %s1576_s3, 256 }
 0x12e   : > { %p1001_p4 = scmp.ne.s32.totalorder %s1531_s5, %s1000_s10  ;;  %p1005_p9 = scmp.lt.u32.totalorder %s1531_s5, %s1576_s3 }
 0x12f   : > { %p1006_p10 = scmp.lt.u32.totalorder %s1004_s25, %s1000_s10  ;;  %p1008_p12 = scmp.lt.u32.totalorder %s1000_s10, %s1531_s5 }
 0x130   : > { %p1002_p7 = pnand %p1001_p4, %p1109_p5 }
 0x131   : > { %p1007_p11 = por %p1006_p10, %p1005_p9 }
 0x132   : > { %p1003_p8 = pneg %p1002_p7 }
 0x133   : > { %p1009_p13 = por %p1008_p12, %p1007_p11 }
 0x135   : > { %p1010_p0 = pnand %p1009_p13, %p1003_p8 }
 0x137   : > { %1013 = shalt.err (!%p1010_p0)
}
 0x138   : > { %947 = dma.vmem_to_hbm [thread:$0]  (%p1109_p5), %s1533_s24, 128, %s1531_s5, %s594_s6  }
 0x139 PF: > { %p953_p1 = scmp.ge.s32.totalorder %s1048_s15, 2  ;;  %s619_s28 = sand.u32 1, %s1036_s12  }
 0x13a   : > { %s620_s29 = scalar_lea.sflag [#allocation3], %s619_s28 }
 0x13b   : > { %p950_p2 = pnand %p953_p1, %p1113_p6 }
 0x13d   : > { %1031 = dma.done.wait (!%p950_p2), %s620_s29, 128  }
 0x13e   : > { %1033 = vsyncadd (!%p950_p2), %s620_s29, 4294967168  ;;  %p13_p3 = scmp.ge.s32.totalorder %s1096_s18, 4   ;;  %s1579_s12 = smov %s1040_s13 }
 0x13f   : > { %s1580_s13 = smov %s1044_s14  ;;  %s1581_s14 = smov %s1107_s21 }
 0x140   : > { %s1582_s15 = smov %s1096_s18  ;;  %15 = sbr.rel (!%p13_p3) target bundleno = 3 (0x3), region = 67 }
 0x147   :  { %625 = vsyncpa [#allocation3], 1 }
 0x148   :  { %627 = vsyncpa [#allocation3 + $0x1], 1 }

</bundles_post_ra>
